<compile_context>
chip_gen: v5e
topology: v5e:2x2
jax: 0.10.0
libtpu: 0.0.40
codegen_flags: <defaults>
</compile_context>

<pallas_src>
import functools
import math

import jax
import jax.numpy as jnp
from jax.experimental import pallas as pl
from jax.experimental.pallas import tpu as pltpu


# -----------------------------------------------------------------------------
# Pallas kernel: input_projection -> [ResidualBlock]*Lyr -> output_proj 1 & 2
# -----------------------------------------------------------------------------
def _diff_block_kernel(x_ref, mts_ref, bcb_ref,
                       Wc_ref, Wm_ref, Wo_ref, bo_ref,
                       Wop1_ref, head_ref, bop2_ref,
                       out_ref, cond_sc, *, n_layers, channels, gate_dtype):
    """One (batch, token-tile) cell of the fused denoising block.

    Kernel-side shapes (channels-first, tokens on lanes):
      x_ref     (1, 1, TT)     raw corrupted MTS (inputdim == 1)      f32
      mts_ref   (1, E, TT)     observed-part embedding                f32
      bcb_ref   (1, Lyr*2C, 1) per-batch cond bias: bcond + bmid +
                               Wmid @ diffusion_projection (folded)   f32
      Wc_ref    (Lyr*2C, E)    stacked cond_projection weights        mm dtype
      Wm_ref    (Lyr, 2C, C)   mid_projection weights                 mm dtype
      Wo_ref    (Lyr, 2C, C)   output_projection weights              mm dtype
      bo_ref    (Lyr, 2C, 1)   output_projection biases               f32
      Wop1_ref  (C, C)         output_projection1 weight              mm dtype
      head_ref  (C, 4)         columns = [Win | bin | bop1 | Wop2]    f32
      bop2_ref  (1, 1)         output_projection2 bias (SMEM scalar)  f32
      out_ref   (1, 1, TT)                                            f32
      cond_sc   (Lyr*2C, TT)   VMEM scratch (cond for all layers)     f32
    """
    f32 = jnp.float32
    C = channels
    mm_dtype = Wm_ref.dtype

    x = x_ref[0]                     # (1, TT)   lane-dense
    mts = mts_ref[0]                 # (E, TT)
    head = head_ref[...]             # (C, 4)
    w_in, b_in = head[:, 0:1], head[:, 1:2]
    b_op1, w_op2 = head[:, 2:3], head[:, 3:4]

    # input_projection (1x1 conv, in_channels = 1) + ReLU  -> (C, TT), f32.
    h = jnp.maximum(w_in * x + b_in, 0.0)

    # cond_projection for ALL layers at once (mts is loop-invariant).  The
    # per-layer mid_projection bias AND the diffusion-step contribution
    # (Wmid[l] @ diffusion_projection) are already folded into bcb in the
    # wrapper.  Staged in VMEM scratch to bound vreg pressure at large TT.
    cond_sc[...] = (jnp.dot(Wc_ref[...], mts.astype(mm_dtype),
                            preferred_element_type=f32)
                    + bcb_ref[0])

    skip_acc = jnp.zeros_like(h)
    inv_sqrt2 = 1.0 / math.sqrt(2.0)
    for l in range(n_layers):                       # static unroll (Lyr small)
        # mid_projection with gate||filter fused into one 2C-row matmul;
        # the diffusion add is exact-folded into the cond bias (see wrapper).
        gf = (jnp.dot(Wm_ref[l], h.astype(mm_dtype),
                      preferred_element_type=f32)
              + cond_sc[2 * C * l:2 * C * (l + 1)])              # (2C, TT) f32
        gfl = gf.astype(gate_dtype)
        # sigmoid(g) = 0.5 * (tanh(g/2) + 1): one EUP tanh per gate element
        # instead of exp + reciprocal.
        sig = 0.5 * (jnp.tanh(0.5 * gfl[:C]) + 1.0)
        z = (sig * jnp.tanh(gfl[C:])).astype(mm_dtype)           # (C, TT)
        # output_projection with residual||skip fused; f32 accumulation.
        rs = jnp.dot(Wo_ref[l], z, preferred_element_type=f32) + bo_ref[l]
        h = (h + rs[:C]) * inv_sqrt2
        skip_acc = skip_acc + rs[C:]

    s = skip_acc * (1.0 / math.sqrt(n_layers))
    s = jnp.maximum(jnp.dot(Wop1_ref[...], s.astype(mm_dtype),
                            preferred_element_type=f32)
                    + b_op1, 0.0)                                # (C, TT)
    # output_projection2 (C -> 1) as VPU multiply + sublane reduction: the
    # store stays a lane-dense (1, TT) row (no masked vst, no N=1 matmul).
    out = jnp.sum(s * w_op2, axis=0, keepdims=True) + bop2_ref[0, 0]
    out_ref[0] = out


def _choose_token_tile(t_padded, batch, requested=None, cap=2048):
    """Pick a lane-dense token tile.

    t_padded is a multiple of 128.  Prefer the largest tile <= cap that
    divides t_padded while still producing >= 2 grid steps (keeps both v7x
    TensorCores fed); per-grid-step overhead (~0.35 us) makes tiny tiles
    overhead-dominated.
    """
    if requested is not None:
        assert requested % 128 == 0 and t_padded % requested == 0, \
            "token_tile must be a multiple of 128 dividing the padded T"
        return requested
    divisors = [tt for tt in range(128, min(cap, t_padded) + 1, 128)
                if t_padded % tt == 0]
    for tt in reversed(divisors):
        if batch * (t_padded // tt) >= 2:
            return tt
    return divisors[-1]


def _auto_compute_dtypes():
    """bf16 matmul operands everywhere; bf16 gating only where EUP/VPU are
    bf16-capable (v6e / v7x).  v5e and unknown chips keep f32 elementwise."""
    try:
        kind = jax.devices()[0].device_kind.lower()
    except Exception:
        kind = ""
    bf16_vector_units = ("v6" in kind) or ("v7" in kind)
    matmul_dtype = jnp.bfloat16
    gate_dtype = jnp.bfloat16 if bf16_vector_units else jnp.float32
    return matmul_dtype, gate_dtype


# -----------------------------------------------------------------------------
# Plain-JAX glue
# -----------------------------------------------------------------------------
# TODO(synk): DiffusionEmbedding class was not provided; assumed the standard
# CSDI sin/cos step table followed by two SiLU-activated Linear(D, D) layers.
def diffusion_embedding(step, p):
    x = p['demb_table'][step]                       # (B, D)
    x = jax.nn.silu(x @ p['Wde1'] + p['bde1'])
    x = jax.nn.silu(x @ p['Wde2'] + p['bde2'])
    return x


def diff_block_forward(x, mts_emb, diffusion_step, params, config):
    B, inputdim, K, L = x.shape
    assert inputdim == 1
    C = config['channels']
    Lyr = config['layers']
    E = config['mts_emb_dim']
    T = K * L
    T_pad = ((T + 127) // 128) * 128                # keep tiling lane-dense
    TT = _choose_token_tile(T_pad, B, config.get('token_tile'),
                            config.get('token_tile_cap', 2048))
    nT = T_pad // TT

    mm_dtype = config.get('matmul_dtype')
    gate_dtype = config.get('gate_dtype')
    if mm_dtype is None or gate_dtype is None:
        auto_mm, auto_gate = _auto_compute_dtypes()
        mm_dtype = mm_dtype if mm_dtype is not None else auto_mm
        gate_dtype = gate_dtype if gate_dtype is not None else auto_gate

    # --- light glue in plain JAX: diffusion embedding + per-layer Linear -----
    demb = diffusion_embedding(diffusion_step, params)                  # (B, D)
    dproj = jnp.einsum('bd,lcd->blc', demb, params['Wdp']) + params['bdp'][None]
    # Exact fold of `y = h + d` through mid_projection: Wmid[l] @ d[b,l] is a
    # token-independent (2C,) vector -> add to the cond/mid bias per batch.
    dmid = jnp.einsum('loc,blc->blo', params['Wmid'], dproj)            # (B,Lyr,2C)
    bcb = (dmid + (params['bcond'] + params['bmid'])[None]
           ).reshape(B, Lyr * 2 * C, 1).astype(jnp.float32)             # (B,Lyr*2C,1)

    # --- pack weights for the kernel (channels-first, gate||filter fused) ----
    Wc_all = params['Wcond'].reshape(Lyr * 2 * C, E).astype(mm_dtype)   # (Lyr*2C,E)
    Wm = params['Wmid'].astype(mm_dtype)                                # (Lyr,2C,C)
    Wo = params['Wout'].astype(mm_dtype)                                # (Lyr,2C,C)
    Wop1 = params['Wop1'].astype(mm_dtype)                              # (C,C)
    bo_all = params['bout'][..., None].astype(jnp.float32)              # (Lyr,2C,1)
    head = jnp.stack([params['Win'], params['bin'],
                      params['bop1'], params['Wop2']], axis=1)          # (C,4) f32
    bop2 = params['bop2'].reshape(1, 1).astype(jnp.float32)             # SMEM scalar

    x_t = x.reshape(B, 1, T).astype(jnp.float32)     # channels-first already
    mts_t = mts_emb.reshape(B, E, T).astype(jnp.float32)
    if T_pad != T:
        pad = T_pad - T
        x_t = jnp.pad(x_t, ((0, 0), (0, 0), (0, pad)))
        mts_t = jnp.pad(mts_t, ((0, 0), (0, 0), (0, pad)))

    def act_spec(rows):
        return pl.BlockSpec((1, rows, TT), lambda b, t: (b, 0, t))

    def resident_spec(arr):              # constant index map -> weight stays resident
        nd = arr.ndim
        return pl.BlockSpec(arr.shape, lambda b, t, _nd=nd: (0,) * _nd)

    weights = (Wc_all, Wm, Wo, bo_all, Wop1, head)

    kernel = functools.partial(_diff_block_kernel, n_layers=Lyr, channels=C,
                               gate_dtype=gate_dtype)
    out = pl.pallas_call(
        kernel,
        out_shape=jax.ShapeDtypeStruct((B, 1, T_pad), jnp.float32),
        grid=(B, nT),
        in_specs=[act_spec(1), act_spec(E),
                  pl.BlockSpec((1, Lyr * 2 * C, 1), lambda b, t: (b, 0, 0))]
                 + [resident_spec(w) for w in weights]
                 + [pl.BlockSpec(memory_space=pltpu.MemorySpace.SMEM)],
        out_specs=pl.BlockSpec((1, 1, TT), lambda b, t: (b, 0, t)),
        scratch_shapes=[pltpu.VMEM((Lyr * 2 * C, TT), jnp.float32)],
        compiler_params=pltpu.CompilerParams(
            dimension_semantics=("parallel", "parallel"),
            vmem_limit_bytes=32 * 1024 * 1024),
    )(x_t, mts_t, bcb, *weights, bop2)
    return out[:, 0, :T].reshape(B, K, L)


# -----------------------------------------------------------------------------
# Deterministic parameter construction (PyTorch (out, in) orientation)
# -----------------------------------------------------------------------------
def init_params(key, config):
    C, E = config['channels'], config['mts_emb_dim']
    D, Lyr = config['diffusion_embedding_dim'], config['layers']
    num_steps = config['num_steps']
    keys = iter(jax.random.split(key, 32))

    def kaiming(k, fan_in, shape):        # kaiming_normal_ for 1x1 convs
        return jax.random.normal(k, shape, jnp.float32) * math.sqrt(2.0 / fan_in)

    def uni(k, fan_in, shape):            # default torch uniform init
        b = 1.0 / math.sqrt(fan_in)
        return jax.random.uniform(k, shape, jnp.float32, -b, b)

    p = {}
    # DiffusionEmbedding (assumed): sin/cos table + two Linear(D, D), SiLU
    half = D // 2
    steps = jnp.arange(num_steps, dtype=jnp.float32)[:, None]
    freqs = (10.0 ** (jnp.arange(half, dtype=jnp.float32) / (half - 1) * 4.0))[None, :]
    tab = steps * freqs
    p['demb_table'] = jnp.concatenate([jnp.sin(tab), jnp.cos(tab)], axis=1)   # (steps, D)
    p['Wde1'] = uni(next(keys), D, (D, D)); p['bde1'] = uni(next(keys), D, (D,))
    p['Wde2'] = uni(next(keys), D, (D, D)); p['bde2'] = uni(next(keys), D, (D,))

    # ResidualBlock params (stacked over layers), (out, in) orientation
    p['Wdp']   = uni(next(keys), D, (Lyr, C, D));       p['bdp']   = uni(next(keys), D, (Lyr, C))
    p['Wcond'] = kaiming(next(keys), E, (Lyr, 2 * C, E)); p['bcond'] = uni(next(keys), E, (Lyr, 2 * C))
    p['Wmid']  = kaiming(next(keys), C, (Lyr, 2 * C, C)); p['bmid']  = uni(next(keys), C, (Lyr, 2 * C))
    p['Wout']  = kaiming(next(keys), C, (Lyr, 2 * C, C)); p['bout']  = uni(next(keys), C, (Lyr, 2 * C))

    # top-level projections
    p['Win']  = kaiming(next(keys), 1, (C,));    p['bin']  = uni(next(keys), 1, (C,))
    p['Wop1'] = kaiming(next(keys), C, (C, C));  p['bop1'] = uni(next(keys), C, (C,))
    p['Wop2'] = jnp.zeros((C,), jnp.float32)     # nn.init.zeros_
    p['bop2'] = uni(next(keys), C, ())
    return p


# -----------------------------------------------------------------------------
# Pure-JAX reference (mirrors the torch forward) for verification
# -----------------------------------------------------------------------------
def reference_forward(x, mts_emb, diffusion_step, p, config):
    B, _, K, L = x.shape
    C, Lyr, E = config['channels'], config['layers'], config['mts_emb_dim']
    T = K * L
    xt = x.reshape(B, 1, T)
    mts = mts_emb.reshape(B, E, T)
    demb = diffusion_embedding(diffusion_step, p)                 # (B, D)
    h = jax.nn.relu(p['Win'][None, :, None] * xt + p['bin'][None, :, None])   # (B, C, T)
    skip_sum = jnp.zeros_like(h)
    for l in range(Lyr):
        d = demb @ p['Wdp'][l].T + p['bdp'][l]                    # (B, C)
        y = h + d[:, :, None]
        gf = (jnp.einsum('oc,bct->bot', p['Wmid'][l], y) + p['bmid'][l][None, :, None]
              + jnp.einsum('oe,bet->bot', p['Wcond'][l], mts) + p['bcond'][l][None, :, None])
        z = jax.nn.sigmoid(gf[:, :C]) * jnp.tanh(gf[:, C:])
        rs = jnp.einsum('oc,bct->bot', p['Wout'][l], z) + p['bout'][l][None, :, None]
        h = (h + rs[:, :C]) / math.sqrt(2.0)
        skip_sum = skip_sum + rs[:, C:]
    s = skip_sum / math.sqrt(Lyr)
    s = jax.nn.relu(jnp.einsum('oc,bct->bot', p['Wop1'], s) + p['bop1'][None, :, None])
    out = jnp.einsum('c,bct->bt', p['Wop2'], s) + p['bop2']
    return out.reshape(B, K, L)


if __name__ == "__main__":
    base_config = dict(channels=16, layers=2, mts_emb_dim=8,
                       diffusion_embedding_dim=16, num_steps=50)
    # Tight-tolerance correctness configs run the kernel in full f32.
    f32_config = dict(base_config, matmul_dtype=jnp.float32,
                      gate_dtype=jnp.float32)

    key = jax.random.PRNGKey(0)
    kp, kx, km, ks = jax.random.split(key, 4)
    params = init_params(kp, base_config)

    B, K, L = 2, 4, 32                       # T = 128 -> a single lane-dense tile
    x    = jax.random.normal(kx, (B, 1, K, L), jnp.float32)
    mts  = jax.random.normal(km, (B, base_config['mts_emb_dim'], K, L), jnp.float32)
    step = jax.random.randint(ks, (B,), 0, base_config['num_steps'])

    out = jax.block_until_ready(diff_block_forward(x, mts, step, params, f32_config))
    ref = reference_forward(x, mts, step, params, f32_config)
    assert out.shape == (B, K, L)
    assert jnp.allclose(out, ref, atol=2e-3, rtol=2e-3), float(jnp.max(jnp.abs(out - ref)))

    # Non-zero final weight (module init zeros it, which would make the output
    # depend only on the last bias).
    p2 = dict(params)
    p2['Wop2'] = 0.1 * jax.random.normal(jax.random.PRNGKey(1),
                                         (base_config['channels'],), jnp.float32)
    out2 = jax.block_until_ready(diff_block_forward(x, mts, step, p2, f32_config))
    ref2 = reference_forward(x, mts, step, p2, f32_config)
    assert jnp.allclose(out2, ref2, atol=2e-3, rtol=2e-3), float(jnp.max(jnp.abs(out2 - ref2)))

    # Multi-tile token grid check (T = 512, forced TT = 128 -> 4 token tiles).
    cfg_tiles = dict(f32_config, token_tile=128)
    K2, L2 = 8, 64
    x3   = jax.random.normal(jax.random.PRNGKey(2), (B, 1, K2, L2), jnp.float32)
    mts3 = jax.random.normal(jax.random.PRNGKey(3),
                             (B, base_config['mts_emb_dim'], K2, L2), jnp.float32)
    out3 = jax.block_until_ready(diff_block_forward(x3, mts3, step, p2, cfg_tiles))
    ref3 = reference_forward(x3, mts3, step, p2, cfg_tiles)
    assert out3.shape == (B, K2, L2)
    assert jnp.allclose(out3, ref3, atol=2e-3, rtol=2e-3), float(jnp.max(jnp.abs(out3 - ref3)))

    # Performance defaults (bf16 matmul operands everywhere; bf16 gating on
    # v6e/v7x) with a non-128-multiple T to exercise the padding path.
    # Loose tolerance: bf16 compute vs the f32 reference.
    K4, L4 = 6, 80                           # T = 480 -> padded to 512
    x4   = jax.random.normal(jax.random.PRNGKey(4), (B, 1, K4, L4), jnp.float32)
    mts4 = jax.random.normal(jax.random.PRNGKey(5),
                             (B, base_config['mts_emb_dim'], K4, L4), jnp.float32)
    out4 = jax.block_until_ready(diff_block_forward(x4, mts4, step, p2, base_config))
    ref4 = reference_forward(x4, mts4, step, p2, base_config)
    assert out4.shape == (B, K4, L4)
    assert jnp.allclose(out4, ref4, atol=1e-1, rtol=1e-1), float(jnp.max(jnp.abs(out4 - ref4)))

    print("KERNEL_OK")
</pallas_src>

<mosaic_0001>
module attributes {stable_mosaic.version = 11 : i64} {
  func.func @_diff_block_kernel(%arg0: i32, %arg1: i32, %arg2: memref<1x1x128xf32, #tpu.memory_space<vmem>>, %arg3: memref<1x8x128xf32, #tpu.memory_space<vmem>>, %arg4: memref<1x64x1xf32, #tpu.memory_space<vmem>>, %arg5: memref<64x8xf32, #tpu.memory_space<vmem>>, %arg6: memref<2x32x16xf32, #tpu.memory_space<vmem>>, %arg7: memref<2x32x16xf32, #tpu.memory_space<vmem>>, %arg8: memref<2x32x1xf32, #tpu.memory_space<vmem>>, %arg9: memref<16x16xf32, #tpu.memory_space<vmem>>, %arg10: memref<16x4xf32, #tpu.memory_space<vmem>>, %arg11: memref<1x1xf32, #tpu.memory_space<smem>>, %arg12: memref<1x1x128xf32, #tpu.memory_space<vmem>>, %arg13: memref<64x128xf32, #tpu.memory_space<vmem>>) attributes {dimension_semantics = [#tpu.dimension_semantics<parallel>, #tpu.dimension_semantics<parallel>], iteration_bounds = array<i64: 2, 1>, scalar_prefetch = 0 : i64, scratch_operands = 1 : i64, tpu.core_type = #tpu.core_type<tc>, window_params = [{transform_indices = @transform_0, window_bounds = array<i64: 1, 1, 128>}, {transform_indices = @transform_1, window_bounds = array<i64: 1, 8, 128>}, {transform_indices = @transform_2, window_bounds = array<i64: 1, 64, 1>}, {pipeline_mode = #tpu.pipeline_mode<synchronous>, transform_indices = @transform_3, window_bounds = array<i64: 64, 8>}, {pipeline_mode = #tpu.pipeline_mode<synchronous>, transform_indices = @transform_4, window_bounds = array<i64: 2, 32, 16>}, {pipeline_mode = #tpu.pipeline_mode<synchronous>, transform_indices = @transform_5, window_bounds = array<i64: 2, 32, 16>}, {pipeline_mode = #tpu.pipeline_mode<synchronous>, transform_indices = @transform_6, window_bounds = array<i64: 2, 32, 1>}, {pipeline_mode = #tpu.pipeline_mode<synchronous>, transform_indices = @transform_7, window_bounds = array<i64: 16, 16>}, {pipeline_mode = #tpu.pipeline_mode<synchronous>, transform_indices = @transform_8, window_bounds = array<i64: 16, 4>}, {transform_indices = @transform_9, window_bounds = array<i64: 1, 1>}, {transform_indices = @transform_10, window_bounds = array<i64: 1, 1, 128>}]} {
    %c0 = arith.constant 0 : index
    %c0_0 = arith.constant 0 : index
    %c0_1 = arith.constant 0 : index
    %0 = vector.load %arg2[%c0, %c0_0, %c0_1] : memref<1x1x128xf32, #tpu.memory_space<vmem>>, vector<1x1x128xf32>
    %1 = vector.shape_cast %0 : vector<1x1x128xf32> to vector<1x128xf32>
    %c0_2 = arith.constant 0 : index
    %c0_3 = arith.constant 0 : index
    %c0_4 = arith.constant 0 : index
    %2 = vector.load %arg3[%c0_2, %c0_3, %c0_4] : memref<1x8x128xf32, #tpu.memory_space<vmem>>, vector<1x8x128xf32>
    %3 = vector.shape_cast %2 : vector<1x8x128xf32> to vector<8x128xf32>
    %c0_5 = arith.constant 0 : index
    %c0_6 = arith.constant 0 : index
    %4 = vector.load %arg10[%c0_5, %c0_6] : memref<16x4xf32, #tpu.memory_space<vmem>>, vector<16x4xf32>
    %5 = vector.extract_strided_slice %4 {offsets = [0, 0], sizes = [16, 1], strides = [1, 1]} : vector<16x4xf32> to vector<16x1xf32>
    %6 = vector.extract_strided_slice %4 {offsets = [0, 1], sizes = [16, 1], strides = [1, 1]} : vector<16x4xf32> to vector<16x1xf32>
    %7 = vector.extract_strided_slice %4 {offsets = [0, 2], sizes = [16, 1], strides = [1, 1]} : vector<16x4xf32> to vector<16x1xf32>
    %8 = vector.extract_strided_slice %4 {offsets = [0, 3], sizes = [16, 1], strides = [1, 1]} : vector<16x4xf32> to vector<16x1xf32>
    %9 = vector.broadcast %5 : vector<16x1xf32> to vector<16x128xf32>
    %10 = vector.broadcast %1 : vector<1x128xf32> to vector<16x128xf32>
    %11 = arith.mulf %9, %10 : vector<16x128xf32>
    %12 = vector.broadcast %6 : vector<16x1xf32> to vector<16x128xf32>
    %13 = arith.addf %11, %12 : vector<16x128xf32>
    %cst = arith.constant 0.000000e+00 : f32
    %14 = vector.broadcast %cst : f32 to vector<16x128xf32>
    %15 = arith.maximumf %13, %14 : vector<16x128xf32>
    %c0_7 = arith.constant 0 : index
    %c0_8 = arith.constant 0 : index
    %16 = vector.load %arg5[%c0_7, %c0_8] : memref<64x8xf32, #tpu.memory_space<vmem>>, vector<64x8xf32>
    %cst_9 = arith.constant dense<0.000000e+00> : vector<64x128xf32>
    %17 = tpu.matmul %16, %3, %cst_9 {dimension_numbers = #tpu.dot_dimension_numbers<[1], [0], [0], [1], [0, 0, 1, 1], [], []>} : vector<64x8xf32>, vector<8x128xf32>, vector<64x128xf32> -> vector<64x128xf32>
    %c0_10 = arith.constant 0 : index
    %c0_11 = arith.constant 0 : index
    %c0_12 = arith.constant 0 : index
    %18 = vector.load %arg4[%c0_10, %c0_11, %c0_12] : memref<1x64x1xf32, #tpu.memory_space<vmem>>, vector<1x64x1xf32>
    %19 = vector.shape_cast %18 : vector<1x64x1xf32> to vector<64x1xf32>
    %20 = vector.broadcast %19 : vector<64x1xf32> to vector<64x128xf32>
    %21 = arith.addf %17, %20 : vector<64x128xf32>
    %c0_13 = arith.constant 0 : index
    %c0_14 = arith.constant 0 : index
    %22 = vector.load %arg13[%c0_13, %c0_14] : memref<64x128xf32, #tpu.memory_space<vmem>>, vector<64x128xf32>
    tpu.vector_store %arg13[%c0_13, %c0_14], %21 {strides = array<i32>} : memref<64x128xf32, #tpu.memory_space<vmem>>, vector<64x128xf32>,
    %cst_15 = arith.constant 0.000000e+00 : f32
    %23 = vector.broadcast %cst_15 : f32 to vector<16x128xf32>
    %c0_16 = arith.constant 0 : index
    %c0_17 = arith.constant 0 : index
    %c0_18 = arith.constant 0 : index
    %24 = vector.load %arg6[%c0_16, %c0_17, %c0_18] : memref<2x32x16xf32, #tpu.memory_space<vmem>>, vector<1x32x16xf32>
    %25 = vector.shape_cast %24 : vector<1x32x16xf32> to vector<32x16xf32>
    %cst_19 = arith.constant dense<0.000000e+00> : vector<32x128xf32>
    %26 = tpu.matmul %25, %15, %cst_19 {dimension_numbers = #tpu.dot_dimension_numbers<[1], [0], [0], [1], [0, 0, 1, 1], [], []>} : vector<32x16xf32>, vector<16x128xf32>, vector<32x128xf32> -> vector<32x128xf32>
    %c0_20 = arith.constant 0 : index
    %c0_21 = arith.constant 0 : index
    %27 = vector.load %arg13[%c0_20, %c0_21] : memref<64x128xf32, #tpu.memory_space<vmem>>, vector<32x128xf32>
    %28 = arith.addf %26, %27 : vector<32x128xf32>
    %29 = vector.extract_strided_slice %28 {offsets = [0, 0], sizes = [16, 128], strides = [1, 1]} : vector<32x128xf32> to vector<16x128xf32>
    %cst_22 = arith.constant 5.000000e-01 : f32
    %30 = vector.broadcast %cst_22 : f32 to vector<16x128xf32>
    %31 = arith.mulf %30, %29 : vector<16x128xf32>
    %32 = math.tanh %31 : vector<16x128xf32>
    %cst_23 = arith.constant 1.000000e+00 : f32
    %33 = vector.broadcast %cst_23 : f32 to vector<16x128xf32>
    %34 = arith.addf %32, %33 : vector<16x128xf32>
    %cst_24 = arith.constant 5.000000e-01 : f32
    %35 = vector.broadcast %cst_24 : f32 to vector<16x128xf32>
    %36 = arith.mulf %35, %34 : vector<16x128xf32>
    %37 = vector.extract_strided_slice %28 {offsets = [16, 0], sizes = [16, 128], strides = [1, 1]} : vector<32x128xf32> to vector<16x128xf32>
    %38 = math.tanh %37 : vector<16x128xf32>
    %39 = arith.mulf %36, %38 : vector<16x128xf32>
    %c0_25 = arith.constant 0 : index
    %c0_26 = arith.constant 0 : index
    %c0_27 = arith.constant 0 : index
    %40 = vector.load %arg7[%c0_25, %c0_26, %c0_27] : memref<2x32x16xf32, #tpu.memory_space<vmem>>, vector<1x32x16xf32>
    %41 = vector.shape_cast %40 : vector<1x32x16xf32> to vector<32x16xf32>
    %cst_28 = arith.constant dense<0.000000e+00> : vector<32x128xf32>
    %42 = tpu.matmul %41, %39, %cst_28 {dimension_numbers = #tpu.dot_dimension_numbers<[1], [0], [0], [1], [0, 0, 1, 1], [], []>} : vector<32x16xf32>, vector<16x128xf32>, vector<32x128xf32> -> vector<32x128xf32>
    %c0_29 = arith.constant 0 : index
    %c0_30 = arith.constant 0 : index
    %c0_31 = arith.constant 0 : index
    %43 = vector.load %arg8[%c0_29, %c0_30, %c0_31] : memref<2x32x1xf32, #tpu.memory_space<vmem>>, vector<1x32x1xf32>
    %44 = vector.shape_cast %43 : vector<1x32x1xf32> to vector<32x1xf32>
    %45 = vector.broadcast %44 : vector<32x1xf32> to vector<32x128xf32>
    %46 = arith.addf %42, %45 : vector<32x128xf32>
    %47 = vector.extract_strided_slice %46 {offsets = [0, 0], sizes = [16, 128], strides = [1, 1]} : vector<32x128xf32> to vector<16x128xf32>
    %48 = arith.addf %15, %47 : vector<16x128xf32>
    %cst_32 = arith.constant 0.707106769 : f32
    %49 = vector.broadcast %cst_32 : f32 to vector<16x128xf32>
    %50 = arith.mulf %48, %49 : vector<16x128xf32>
    %51 = vector.extract_strided_slice %46 {offsets = [16, 0], sizes = [16, 128], strides = [1, 1]} : vector<32x128xf32> to vector<16x128xf32>
    %52 = arith.addf %23, %51 : vector<16x128xf32>
    %c1 = arith.constant 1 : index
    %c0_33 = arith.constant 0 : index
    %c0_34 = arith.constant 0 : index
    %53 = vector.load %arg6[%c1, %c0_33, %c0_34] : memref<2x32x16xf32, #tpu.memory_space<vmem>>, vector<1x32x16xf32>
    %54 = vector.shape_cast %53 : vector<1x32x16xf32> to vector<32x16xf32>
    %cst_35 = arith.constant dense<0.000000e+00> : vector<32x128xf32>
    %55 = tpu.matmul %54, %50, %cst_35 {dimension_numbers = #tpu.dot_dimension_numbers<[1], [0], [0], [1], [0, 0, 1, 1], [], []>} : vector<32x16xf32>, vector<16x128xf32>, vector<32x128xf32> -> vector<32x128xf32>
    %c32 = arith.constant 32 : index
    %c0_36 = arith.constant 0 : index
    %56 = vector.load %arg13[%c32, %c0_36] : memref<64x128xf32, #tpu.memory_space<vmem>>, vector<32x128xf32>
    %57 = arith.addf %55, %56 : vector<32x128xf32>
    %58 = vector.extract_strided_slice %57 {offsets = [0, 0], sizes = [16, 128], strides = [1, 1]} : vector<32x128xf32> to vector<16x128xf32>
    %cst_37 = arith.constant 5.000000e-01 : f32
    %59 = vector.broadcast %cst_37 : f32 to vector<16x128xf32>
    %60 = arith.mulf %59, %58 : vector<16x128xf32>
    %61 = math.tanh %60 : vector<16x128xf32>
    %cst_38 = arith.constant 1.000000e+00 : f32
    %62 = vector.broadcast %cst_38 : f32 to vector<16x128xf32>
    %63 = arith.addf %61, %62 : vector<16x128xf32>
    %cst_39 = arith.constant 5.000000e-01 : f32
    %64 = vector.broadcast %cst_39 : f32 to vector<16x128xf32>
    %65 = arith.mulf %64, %63 : vector<16x128xf32>
    %66 = vector.extract_strided_slice %57 {offsets = [16, 0], sizes = [16, 128], strides = [1, 1]} : vector<32x128xf32> to vector<16x128xf32>
    %67 = math.tanh %66 : vector<16x128xf32>
    %68 = arith.mulf %65, %67 : vector<16x128xf32>
    %c1_40 = arith.constant 1 : index
    %c0_41 = arith.constant 0 : index
    %c0_42 = arith.constant 0 : index
    %69 = vector.load %arg7[%c1_40, %c0_41, %c0_42] : memref<2x32x16xf32, #tpu.memory_space<vmem>>, vector<1x32x16xf32>
    %70 = vector.shape_cast %69 : vector<1x32x16xf32> to vector<32x16xf32>
    %cst_43 = arith.constant dense<0.000000e+00> : vector<32x128xf32>
    %71 = tpu.matmul %70, %68, %cst_43 {dimension_numbers = #tpu.dot_dimension_numbers<[1], [0], [0], [1], [0, 0, 1, 1], [], []>} : vector<32x16xf32>, vector<16x128xf32>, vector<32x128xf32> -> vector<32x128xf32>
    %c1_44 = arith.constant 1 : index
    %c0_45 = arith.constant 0 : index
    %c0_46 = arith.constant 0 : index
    %72 = vector.load %arg8[%c1_44, %c0_45, %c0_46] : memref<2x32x1xf32, #tpu.memory_space<vmem>>, vector<1x32x1xf32>
    %73 = vector.shape_cast %72 : vector<1x32x1xf32> to vector<32x1xf32>
    %74 = vector.broadcast %73 : vector<32x1xf32> to vector<32x128xf32>
    %75 = arith.addf %71, %74 : vector<32x128xf32>
    %76 = vector.extract_strided_slice %75 {offsets = [16, 0], sizes = [16, 128], strides = [1, 1]} : vector<32x128xf32> to vector<16x128xf32>
    %77 = arith.addf %52, %76 : vector<16x128xf32>
    %cst_47 = arith.constant 0.707106769 : f32
    %78 = vector.broadcast %cst_47 : f32 to vector<16x128xf32>
    %79 = arith.mulf %77, %78 : vector<16x128xf32>
    %c0_48 = arith.constant 0 : index
    %c0_49 = arith.constant 0 : index
    %80 = vector.load %arg9[%c0_48, %c0_49] : memref<16x16xf32, #tpu.memory_space<vmem>>, vector<16x16xf32>
    %cst_50 = arith.constant dense<0.000000e+00> : vector<16x128xf32>
    %81 = tpu.matmul %80, %79, %cst_50 {dimension_numbers = #tpu.dot_dimension_numbers<[1], [0], [0], [1], [0, 0, 1, 1], [], []>} : vector<16x16xf32>, vector<16x128xf32>, vector<16x128xf32> -> vector<16x128xf32>
    %82 = vector.broadcast %7 : vector<16x1xf32> to vector<16x128xf32>
    %83 = arith.addf %81, %82 : vector<16x128xf32>
    %cst_51 = arith.constant 0.000000e+00 : f32
    %84 = vector.broadcast %cst_51 : f32 to vector<16x128xf32>
    %85 = arith.maximumf %83, %84 : vector<16x128xf32>
    %86 = vector.broadcast %8 : vector<16x1xf32> to vector<16x128xf32>
    %87 = arith.mulf %85, %86 : vector<16x128xf32>
    %cst_52 = arith.constant dense<0.000000e+00> : vector<128xf32>
    %88 = vector.multi_reduction <add>, %87, %cst_52 [0] : vector<16x128xf32> to vector<128xf32>
    %89 = vector.shape_cast %88 : vector<128xf32> to vector<1x128xf32>
    %c0_53 = arith.constant 0 : index
    %c0_54 = arith.constant 0 : index
    %90 = memref.load %arg11[%c0_53, %c0_54] : memref<1x1xf32, #tpu.memory_space<smem>>
    %91 = vector.broadcast %90 : f32 to vector<1x128xf32>
    %92 = arith.addf %89, %91 : vector<1x128xf32>
    %c0_55 = arith.constant 0 : index
    %c0_56 = arith.constant 0 : index
    %c0_57 = arith.constant 0 : index
    %93 = vector.load %arg12[%c0_55, %c0_56, %c0_57] : memref<1x1x128xf32, #tpu.memory_space<vmem>>, vector<1x1x128xf32>
    %94 = vector.shape_cast %93 : vector<1x1x128xf32> to vector<1x128xf32>
    %95 = vector.shape_cast %92 : vector<1x128xf32> to vector<1x1x128xf32>
    tpu.vector_store %arg12[%c0_55, %c0_56, %c0_57], %95 {strides = array<i32>} : memref<1x1x128xf32, #tpu.memory_space<vmem>>, vector<1x1x128xf32>,
    return
  }
  func.func @transform_0(%arg0: i32, %arg1: i32) -> (i32, i32, i32) {
    %c0_i32 = arith.constant 0 : i32
    %c0_i32_0 = arith.constant 0 : i32
    return %arg0, %c0_i32, %arg1 : i32, i32, i32
  }
  func.func @transform_1(%arg0: i32, %arg1: i32) -> (i32, i32, i32) {
    %c0_i32 = arith.constant 0 : i32
    %c0_i32_0 = arith.constant 0 : i32
    return %arg0, %c0_i32, %arg1 : i32, i32, i32
  }
  func.func @transform_2(%arg0: i32, %arg1: i32) -> (i32, i32, i32) {
    %c0_i32 = arith.constant 0 : i32
    %c0_i32_0 = arith.constant 0 : i32
    %c0_i32_1 = arith.constant 0 : i32
    return %arg0, %c0_i32, %c0_i32_0 : i32, i32, i32
  }
  func.func @transform_3(%arg0: i32, %arg1: i32) -> (i32, i32) {
    %c0_i32 = arith.constant 0 : i32
    %c0_i32_0 = arith.constant 0 : i32
    %c0_i32_1 = arith.constant 0 : i32
    return %c0_i32, %c0_i32_0 : i32, i32
  }
  func.func @transform_4(%arg0: i32, %arg1: i32) -> (i32, i32, i32) {
    %c0_i32 = arith.constant 0 : i32
    %c0_i32_0 = arith.constant 0 : i32
    %c0_i32_1 = arith.constant 0 : i32
    %c0_i32_2 = arith.constant 0 : i32
    return %c0_i32, %c0_i32_0, %c0_i32_1 : i32, i32, i32
  }
  func.func @transform_5(%arg0: i32, %arg1: i32) -> (i32, i32, i32) {
    %c0_i32 = arith.constant 0 : i32
    %c0_i32_0 = arith.constant 0 : i32
    %c0_i32_1 = arith.constant 0 : i32
    %c0_i32_2 = arith.constant 0 : i32
    return %c0_i32, %c0_i32_0, %c0_i32_1 : i32, i32, i32
  }
  func.func @transform_6(%arg0: i32, %arg1: i32) -> (i32, i32, i32) {
    %c0_i32 = arith.constant 0 : i32
    %c0_i32_0 = arith.constant 0 : i32
    %c0_i32_1 = arith.constant 0 : i32
    %c0_i32_2 = arith.constant 0 : i32
    return %c0_i32, %c0_i32_0, %c0_i32_1 : i32, i32, i32
  }
  func.func @transform_7(%arg0: i32, %arg1: i32) -> (i32, i32) {
    %c0_i32 = arith.constant 0 : i32
    %c0_i32_0 = arith.constant 0 : i32
    %c0_i32_1 = arith.constant 0 : i32
    return %c0_i32, %c0_i32_0 : i32, i32
  }
  func.func @transform_8(%arg0: i32, %arg1: i32) -> (i32, i32) {
    %c0_i32 = arith.constant 0 : i32
    %c0_i32_0 = arith.constant 0 : i32
    %c0_i32_1 = arith.constant 0 : i32
    return %c0_i32, %c0_i32_0 : i32, i32
  }
  func.func @transform_9(%arg0: i32, %arg1: i32) -> (i32, i32) {
    %c0_i32 = arith.constant 0 : i32
    %c0_i32_0 = arith.constant 0 : i32
    %c0_i32_1 = arith.constant 0 : i32
    return %c0_i32, %c0_i32_0 : i32, i32
  }
  func.func @transform_10(%arg0: i32, %arg1: i32) -> (i32, i32, i32) {
    %c0_i32 = arith.constant 0 : i32
    %c0_i32_0 = arith.constant 0 : i32
    return %arg0, %c0_i32, %arg1 : i32, i32, i32
  }
}

</mosaic_0001>

<bundles_post_ra>
// kernel: tpu_custom_call.1
= control target key start
LH: loop header
LB: loop body
LE: loop exit
PB: predicated region body
PF: predicated region fallthrough
CT: control target
= control target key end

     0   :  { %s1578_s0 = inlined_call_operand.vmem [shape: f32[2,1,128], index: 0, kind: input, shape index: {}]   ;;  %s1579_s1 = inlined_call_operand.vmem [shape: f32[2,8,128], index: 1, kind: input, shape index: {}]   ;;  %s1580_s2 = inlined_call_operand.vmem [shape: f32[2,64,1], index: 2, kind: input, shape index: {}]   ;;  %s1581_s3 = inlined_call_operand.vmem [shape: f32[64,8], index: 3, kind: input, shape index: {}]   ;;  %s1582_s4 = inlined_call_operand.vmem [shape: f32[2,32,16], index: 4, kind: input, shape index: {}]   ;;  %s1583_s5 = inlined_call_operand.vmem [shape: f32[2,32,16], index: 5, kind: input, shape index: {}]   ;;  %s1584_s6 = inlined_call_operand.vmem [shape: f32[2,32,1], index: 6, kind: input, shape index: {}]   ;;  %s1585_s7 = inlined_call_operand.vmem [shape: f32[16,16], index: 7, kind: input, shape index: {}]   ;;  %s1586_s8 = inlined_call_operand.vmem [shape: f32[16,4], index: 8, kind: input, shape index: {}]   ;;  %s1587_s9 = inlined_call_operand.<no memory space> [shape: f32[1,1], index: 9, kind: input, shape index: {}]   ;;  %s1588_s10 = inlined_call_operand.hbm [shape: f32[2,1,128], index: 10, kind: output, shape index: {}]  }
   0x1   :  { %15 = sst [smem:[#allocation3]] %s1587_s9 }
   0x2   :  { %16 = vsyncpa [#allocation5], 0 }
   0x3   :  { %18 = vsyncpa [#allocation5 + $0x1], 0  ;;  %s1302_s15 = smov 0   ;;  %s1304_s16 = smov 0  }
   0x4   :  { %s1306_s17 = smov 0   ;;  %s1308_s18 = smov 0  }
   0x5   :  { %s1310_s19 = smov 0   ;;  %s1312_s20 = smov 0  }
   0x6 LB: > { %1591 = sst [smem:[#allocation7_spill]] %s1234_s19  ;;  %s1023_s9 = sadd.s32 4294967295, %s1238_s20   ;;  %s1238_s20 = sphi %s1312_s20, %s24_s20   ;;  %s1234_s19 = sphi %s1310_s19, %s1598_s19   ;;  %s1230_s18 = sphi %s1308_s18, %s1597_s18   ;;  %s1226_s17 = sphi %s1306_s17, %s1601_s17   ;;  %s1222_s16 = sphi %s1304_s16, %s1600_s16   ;;  %s1218_s15 = sphi %s1302_s15, %s1599_s15  }
   0x7   : > { %s1024_s21 = sadd.s32 4294967294, %s1238_s20   ;;  %s36_s22 = sadd.s32 1, %s1234_s19 }
   0x8   : > { %s274_s23 = sadd.s32 1, %s1226_s17  ;;  %p38_p0 = scmp.ge.s32.totalorder %s36_s22, 2 }
   0x9   : > { %p284_p1 = scmp.ne.s32.totalorder %s1226_s17, %s1222_s16  ;;  %p285_p2 = scmp.eq.s32.totalorder %s1023_s9, 1 }
   0xa   : > { %p290_p3 = scmp.ne.s32.totalorder %s1222_s16, %s1218_s15  ;;  %s1603_s22 = smov (%p38_p0, %s36_s22), 0 }
   0xb   : > { %1592 = sst [smem:[#allocation8_spill]] %s1603_s22  ;;  %p1342_p4 = por %p285_p2, %p284_p1 }
   0xc   : > { %p291_p5 = scmp.eq.s32.totalorder %s1024_s21, 1  ;;  %s269_s25 = ssub.s32 %s1234_s19, %s1603_s22 }
   0xd   : > { %p1027_p6 = scmp.ge.s32.totalorder %s1238_s20, 1  ;;  %p272_p7 = scmp.eq.s32.totalorder %s269_s25, 0 }
   0xe   : > { %p1349_p8 = por %p291_p5, %p290_p3  ;;  %p357_p9 = scmp.lt.s32.totalorder %s1238_s20, 3 }
   0xf   : > { %s1355_s27 = scalar_select %p272_p7, %s1226_s17, %s274_s23  }
  0x10   : > { %p358_p10 = pnand %p1027_p6, %p357_p9 }
  0x11   : > { %1595 = sst [smem:[#allocation9_spill]] %s1355_s27  ;;  %p407_p11 = scmp.lt.s32.totalorder (!%p358_p10), %s1230_s18, 1 }
  0x12   : > { %361 = sbr.rel (%p358_p10) target bundleno = 960 (0x3c0), region = 60  ;;  %s928_s9 = scalar_lea.hbm (!%p358_p10), %s1588_s10, %s1230_s18 }
  0x13   : > { %s932_s19 = sshll.u32 (!%p358_p10), %s928_s9, 4  ;;  %s1180_s29 = scalar_lea.hbm (!%p358_p10), %s1588_s10, 2  ;;  %s933_s19 = int_to_ptr.hbm [resolvable:$true] %s932_s19 }
  0x14   : > { %s1174_s23 = sshra.s32 (!%p358_p10), %s933_s19, 4  ;;  %s1175_s23 = int_to_ptr.hbm [resolvable:$true] %s1174_s23 }
  0x15   : > { %s1176_s25 = scalar_lea.hbm (!%p358_p10), %s1175_s23, 1  ;;  %p1181_p1 = scmp.lt.s32.totalorder (!%p358_p10), %s1175_s23, %s1588_s10 }
  0x16   : > { %p1177_p12 = scmp.ne.s32.totalorder (!%p358_p10), %s1175_s23, %s1176_s25  ;;  %p1182_p2 = scmp.lt.s32.totalorder (!%p358_p10), %s1180_s29, %s1176_s25 }
  0x17   : > { %v1360_v0 = vld [vmem:[%s1586_s8 + $0x8] sm:$0xff]  ;;  %v1240_v1 = vmov 1   ;;  %v1241_v2 = vmov 0   ;;  %s1366_s30 = scalar_select %p407_p11, %s1230_s18, 1  ;;  %v456_v3 = vld [vmem:[%s1581_s3] sm:$0xff]  ;;  %vm512_vm0 = vcmask 64512  }
  0x18   : > { %1135 = vset.pattern.permute.xlu1 %v1240_v1  ;;  %1134 = vset.pattern.permute.xlu0 %v1241_v2  ;;  %v463_v4 = vld [vmem:[%s1581_s3 + $0x38] sm:$0xff]  ;;  %v1385_v6 = vld [vmem:[%s1586_s8] sm:$0xff]  ;;  %v457_v7 = vld [vmem:[%s1581_s3 + $0x8] sm:$0xff]  ;;  %vm594_vm1 = vcmask 130048   ;;  %p1178_p13 = pnand %p1177_p12, %p1342_p4  ;;  %p1183_p3 = por %p1182_p2, %p1181_p1 }
  0x19   : > { %449 = vperm.xlu1 %1135, %v1360_v0   ;;  %436 = vperm.xlu0 %1134, %v1360_v0   ;;  %s1028_s11 = sshll.u32 %s1366_s30, 3  ;;  %s412_s22 = scalar_lea.vmem %s1578_s0, %s1366_s30  ;;  %v458_v9 = vld [vmem:[%s1581_s3 + $0x10] sm:$0xff]  ;;  %v652_v10 = vld [vmem:[%s1584_s6] sm:$0xff]  ;;  %v459_v11 = vld [vmem:[%s1581_s3 + $0x18] sm:$0xff] }
  0x1a   : > { %1136 = vset.pattern.permute.xlu2 %v1241_v2  ;;  %s419_s14 = scalar_lea.vmem %s1579_s1, %s1028_s11  ;;  %s1071_s11 = sshll.u32 %s1366_s30, 6  ;;  %v1062_v13 = vld [vmem:[%s1584_s6 + $0x38] sm:$0xff]  ;;  %v460_v15 = vld [vmem:[%s1581_s3 + $0x20] sm:$0xff]  ;;  %v461_v18 = vld [vmem:[%s1581_s3 + $0x28] sm:$0xff] }
  0x1b   : > { %v426_v5 = vld [vmem:[%s419_s14] sm:$0xff]  ;;  %s1395_s14 = scalar_lea.vmem %s1580_s2, %s1071_s11  ;;  %v653_v24 = vld [vmem:[%s1584_s6 + $0x8] sm:$0xff]  ;;  %v462_v25 = vld [vmem:[%s1581_s3 + $0x30] sm:$0xff]  ;;  %s405_s30 = sand.u32 1, %s1222_s16  }
  0x1c   : > { %552 = vmatpush.msra.mxu0 %v426_v5  ;;  %1072 = vmatpush.msra.mxu1 %v426_v5  ;;  %v467_v8 = vld [vmem:[%s1395_s14 + $0x18] sm:$0xff]  ;;  %v465_v14 = vld [vmem:[%s1395_s14 + $0x8] sm:$0xff]  ;;  %v466_v16 = vld [vmem:[%s1395_s14 + $0x10] sm:$0xff]  ;;  %s406_s21 = scalar_lea.vmem [#allocation4], %s405_s30  ;;  %s919_s27 = scalar_lea.sflag [#allocation5], %s405_s30 }
  0x1d   : > { %1031 = vmatmul.msk.f32.vlgmr.msra.gmra.mxu0 %vm512_vm0, %v456_v3  ;;  %1038 = vmatmul.msk.f32.vlgmr.msra.gmra.mxu1 %vm512_vm0, %v463_v4  ;;  %v471_v12 = vld [vmem:[%s1395_s14 + $0x38] sm:$0xff]  ;;  %v464_v17 = vld [vmem:[%s1395_s14] sm:$0xff]  ;;  %v469_v22 = vld [vmem:[%s1395_s14 + $0x28] sm:$0xff]  ;;  %p1179_p0 = pneg %p1178_p13 }
  0x1e   : > { %479 = vperm.xlu2 %1136, %v465_v14   ;;  %v1143_v19 = vld [vmem:[%s412_s22] ss:$0 sm:$0xff]  ;;  %v470_v29 = vld [vmem:[%s1395_s14 + $0x30] sm:$0xff]  ;;  %v587_v36 = vld [vmem:[%s1582_s4 + $0x8] sm:$0xff]  ;;  %s914_s22 = sld [smem:[#allocation3]] }
  0x1f   : > { %v468_v32 = vld [vmem:[%s1395_s14 + $0x20] sm:$0xff]  ;;  %v654_v37 = vld [vmem:[%s1584_s6 + $0x10] sm:$0xff]  ;;  %v655_v38 = vld [vmem:[%s1584_s6 + $0x18] sm:$0xff]  ;;  %s930_s14 = sshll.u32 %s406_s21, 4  ;;  %p1184_p5 = pnand %p1183_p3, %p1179_p0  ;;  %s931_s14 = int_to_ptr.vmem [resolvable:$true] %s930_s14 }
  0x20   : > { %v586_v35 = vld [vmem:[%s1582_s4] sm:$0xff]  ;;  %v588_v39 = vld [vmem:[%s1582_s4 + $0x10] sm:$0xff]  ;;  %v589_v41 = vld [vmem:[%s1582_s4 + $0x18] sm:$0xff] }
  0x21   : > { %445 = vperm.xlu1 %1135, %v1385_v6   ;;  %431 = vperm.xlu0 %1134, %v1385_v6   ;;  %v1061_v40 = vld [vmem:[%s1584_s6 + $0x30] sm:$0xff]  ;;  %v649_v14 = vld [vmem:[%s1583_s5 + $0x8] sm:$0xff] }
  0x25   : > { %1032 = vmatmul.msk.f32.gmra.mxu0 %vm512_vm0, %v457_v7 }
  0x26   : > { %474 = vperm.xlu2 %1136, %v464_v17  }
  0x29   : > { %489 = vperm.xlu0 %1134, %v467_v8   ;;  %1137 = vset.pattern.permute.xlu1 %v1241_v2 }
  0x2a   : > { %484 = vperm.xlu1 %1137, %v466_v16   ;;  %v651_v16 = vld [vmem:[%s1583_s5 + $0x18] sm:$0xff] }
  0x2d   : > { %1033 = vmatmul.msk.f32.gmra.mxu0 %vm512_vm0, %v458_v9 }
  0x2e   : > { %663 = vperm.xlu2 %1136, %v653_v24  }
  0x31   : > { %658 = vperm.xlu0 %1134, %v652_v10  }
  0x32   : > { %499 = vperm.xlu1 %1137, %v469_v22  }
  0x35   : > { %1034 = vmatmul.msk.f32.gmra.mxu0 %vm512_vm0, %v459_v11 }
  0x36   : > { %494 = vperm.xlu2 %1136, %v468_v32  }
  0x39   : > { %509 = vperm.xlu0 %1134, %v471_v12  }
  0x3a   : > { %504 = vperm.xlu1 %1137, %v470_v29   ;;  %v1048_v29 = vld [vmem:[%s1582_s4 + $0x28] sm:$0xff] }
  0x3d   : > { %1035 = vmatmul.msk.f32.gmra.mxu0 %vm512_vm0, %v460_v15  ;;  %v650_v15 = vld [vmem:[%s1583_s5 + $0x10] sm:$0xff] }
  0x3e   : > { %673 = vperm.xlu2 %1136, %v655_v38  }
  0x41   : > { %810 = vperm.xlu0 %1134, %v1062_v13   ;;  %v648_v13 = vld [vmem:[%s1583_s5] sm:$0xff] }
  0x42   : > { %668 = vperm.xlu1 %1137, %v654_v37  }
  0x45   : > { %1036 = vmatmul.msk.f32.gmra.mxu0 %vm512_vm0, %v461_v18 }
  0x46   : > { %805 = vperm.xlu2 %1136, %v1061_v40  }
  0x4d   : > { %1037 = vmatmul.msk.f32.gmra.mxu0 %vm512_vm0, %v462_v25 }
  0x78   : > { %v480_v44 = vpop.permute.xlu2 %479 }
  0x80   : > { %v475_v49 = vpop.permute.xlu2 %474 }
  0x8b   : > { %v450_v20 = vpop.permute.xlu1 %449  ;;  %v437_v21 = vpop.permute.xlu0 %436 }
  0x8c   : > { %v443_v23 = vmul.f32 %v1143_v19, %v437_v21 }
  0x8e   : > { %v453_v26 = vadd.f32 %v450_v20, %v443_v23  ;;  %v664_v20 = vpop.permute.xlu2 %663 }
  0x90   : > { %v1441_v27 = vmax.f32 %v453_v26, 0.0 }
  0x92   : > { %621 = vmatpush.msrb.mxu1 %v1441_v27  ;;  %1073 = vmatpush.msra.mxu3 %v1441_v27 }
  0x93   : > { %v432_v28 = vpop.permute.xlu0 %431  ;;  %v446_v31 = vpop.permute.xlu1 %445 }
  0x94   : > { %v442_v30 = vmul.f32 %v1143_v19, %v432_v28  ;;  %v1047_v28 = vld [vmem:[%s1582_s4 + $0x20] sm:$0xff] }
  0x96   : > { %v452_v33 = vadd.f32 %v446_v31, %v442_v30  ;;  %v1050_v30 = vld [vmem:[%s1582_s4 + $0x38] sm:$0xff]  ;;  %v495_v37 = vpop.permute.xlu2 %494 }
  0x98   : > { %v1447_v34 = vmax.f32 %v452_v33, 0.0 }
  0x9a   : > { %622 = vmatpush.msrb.mxu1 %v1447_v34  ;;  %1074 = vmatpush.msra.mxu3 %v1447_v34  ;;  %v554_v42 = vpop.f32.mrf.mxu0  ;;  %v1476_v45 = vpop.f32.mrf.mxu1 }
  0x9b   : > { %1039 = vmatmul.msk.f32.vlgmr.msrb.gmra.mxu1 %vm594_vm1, %v586_v35  ;;  %1040 = vmatmul.msk.f32.vlgmr.msra.gmra.mxu3 %vm594_vm1, %v587_v36  ;;  %v555_v51 = vadd.f32 %v554_v42, %v475_v49  ;;  %v490_v60 = vpop.permute.xlu0 %489 }
  0x9c   : > { %v485_v56 = vpop.permute.xlu1 %484 }
  0xa2   : > { %v557_v43 = vpop.f32.mrf.mxu0 }
  0xa3   : > { %1041 = vmatmul.msk.f32.gmra.mxu3 %vm594_vm1, %v588_v39  ;;  %v558_v46 = vadd.f32 %v557_v43, %v480_v44  ;;  %v659_v18 = vpop.permute.xlu0 %658 }
  0xaa   : > { %v560_v48 = vpop.f32.mrf.mxu0 }
  0xab   : > { %1042 = vmatmul.msk.f32.gmra.mxu3 %vm594_vm1, %v589_v41  ;;  %v561_v58 = vadd.f32 %v560_v48, %v485_v56 }
  0xb2   : > { %v563_v59 = vpop.f32.mrf.mxu0 }
  0xb3   : > { %v564_v62 = vadd.f32 %v563_v59, %v490_v60 }
  0xba   : > { %v566_v31 = vpop.f32.mrf.mxu0 }
  0xbb   : > { %v567_v38 = vadd.f32 %v566_v31, %v495_v37 }
  0xc2   : > { %v569_v33 = vpop.f32.mrf.mxu0 }
  0xca   : > { %v572_v43 = vpop.f32.mrf.mxu0 }
 0x118   : > { %v624_v50 = vpop.f32.mrf.mxu1 }
 0x119   : > { %v625_v53 = vadd.f32 %v624_v50, %v555_v51 }
 0x11b   : > { %v636_v57 = vmul.f32 0.5, %v625_v53 }
 0x11e   : > { %v627_v47 = vpop.f32.mrf.mxu3 }
 0x11f   : > { %v628_v52 = vadd.f32 %v627_v47, %v558_v46  ;;  %v510_v47 = vpop.permute.xlu0 %509 }
 0x120   : > { %v576_v50 = vadd.f32 %v1476_v45, %v510_v47  ;;  %v1056_v45 = vld [vmem:[%s1583_s5 + $0x28] sm:$0xff] }
 0x121   : > { %v637_v54 = vmul.f32 0.5, %v628_v52 }
 0x123   : > { %1144 = vtanh.f32 %v637_v54 }
 0x124   : > { %1146 = vtanh.f32 %v636_v57 }
 0x126   : > { %v630_v55 = vpop.f32.mrf.mxu3 }
 0x127   : > { %v631_v61 = vadd.f32 %v630_v55, %v561_v58 }
 0x129   : > { %v1145_v1 = vpop.eup %1144  ;;  %1148 = vtanh.f32 %v631_v61 }
 0x12a   : > { %v1147_v3 = vpop.eup %1146  ;;  %v641_v4 = vadd.f32 1.0, %v1145_v1  ;;  %v1057_v1 = vld [vmem:[%s1583_s5 + $0x30] sm:$0xff] }
 0x12b   : > { %v640_v5 = vadd.f32 1.0, %v1147_v3 }
 0x12c   : > { %v643_v8 = vmul.f32 0.5, %v641_v4 }
 0x12d   : > { %v642_v11 = vmul.f32 0.5, %v640_v5  ;;  %v1242_v5 = vmov 2  }
 0x12e   : > { %v633_v63 = vpop.f32.mrf.mxu3  ;;  %1139 = vset.pattern.permute.xlu1 %v1242_v5  ;;  %1138 = vset.pattern.permute.xlu0 %v1242_v5 }
 0x12f   : > { %v634_v2 = vadd.f32 %v633_v63, %v564_v62  ;;  %v1149_v7 = vpop.eup %1148  ;;  %v1055_v63 = vld [vmem:[%s1583_s5 + $0x20] sm:$0xff]  ;;  %863 = vperm.xlu1 %1139, %v1360_v0   ;;  %859 = vperm.xlu0 %1138, %v1385_v6  }
 0x130   : > { %v646_v12 = vmul.f32 %v1149_v7, %v642_v11  ;;  %v674_v7 = vpop.permute.xlu2 %673 }
 0x131   : > { %1150 = vtanh.f32 %v634_v2  ;;  %v1058_v2 = vld [vmem:[%s1583_s5 + $0x38] sm:$0xff] }
 0x137   : > { %v1151_v9 = vpop.eup %1150 }
 0x138   : > { %v647_v10 = vmul.f32 %v1151_v9, %v643_v8  ;;  %v1243_v9 = vmov 3   ;;  %v806_v11 = vpop.permute.xlu2 %805 }
 0x139   : > { %1140 = vset.pattern.permute.xlu2 %v1243_v9  ;;  %1141 = vset.pattern.permute.xlu1 %v1243_v9 }
 0x13a   : > { %702 = vmatpush.msra.mxu2 %v647_v10  ;;  %898 = vperm.xlu2 %1140, %v1385_v6   ;;  %v856_v6 = vld [vmem:[%s1585_s7] sm:$0xff] }
 0x13b   : > { %1142 = vset.pattern.permute.xlu0 %v1243_v9  ;;  %902 = vperm.xlu1 %1141, %v1360_v0   ;;  %v857_v0 = vld [vmem:[%s1585_s7 + $0x8] sm:$0xff] }
 0x13c   : > { %703 = vmatpush.msra.mxu2 %v646_v12 }
 0x13d   : > { %1043 = vmatmul.msk.f32.vlgmr.msra.gmra.mxu2 %vm594_vm1, %v648_v13  ;;  %v811_v13 = vpop.permute.xlu0 %810 }
 0x145   : > { %1044 = vmatmul.msk.f32.gmra.mxu2 %vm594_vm1, %v649_v14 }
 0x14d   : > { %1045 = vmatmul.msk.f32.gmra.mxu2 %vm594_vm1, %v650_v15 }
 0x155   : > { %1046 = vmatmul.msk.f32.gmra.mxu2 %vm594_vm1, %v651_v16 }
 0x1c0   : > { %v705_v17 = vpop.f32.mrf.mxu2 }
 0x1c1   : > { %v706_v19 = vadd.f32 %v705_v17, %v659_v18 }
 0x1c3   : > { %v717_v24 = vadd.f32 %v706_v19, %v1447_v34  ;;  %v500_v34 = vpop.permute.xlu1 %499 }
 0x1c4   : > { %v570_v36 = vadd.f32 %v569_v33, %v500_v34 }
 0x1c5   : > { %v719_v26 = vmul.f32 0.70710677, %v717_v24 }
 0x1c8   : > { %v708_v21 = vpop.f32.mrf.mxu2 }
 0x1c9   : > { %v709_v22 = vadd.f32 %v708_v21, %v664_v20 }
 0x1cb   : > { %v718_v23 = vadd.f32 %v709_v22, %v1441_v27  ;;  %v1049_v27 = vld [vmem:[%s1582_s4 + $0x30] sm:$0xff]  ;;  %v505_v46 = vpop.permute.xlu1 %504 }
 0x1cc   : > { %v573_v48 = vadd.f32 %v572_v43, %v505_v46 }
 0x1cd   : > { %v720_v25 = vmul.f32 0.70710677, %v718_v23 }
 0x1cf   : > { %758 = vmatpush.msrb.mxu3 %v720_v25 }
 0x1d0   : > { %v711_v8 = vpop.f32.mrf.mxu2 }
 0x1d1   : > { %759 = vmatpush.msrb.mxu3 %v719_v26  ;;  %v860_v26 = vpop.permute.xlu0 %859 }
 0x1d2   : > { %1051 = vmatmul.msk.f32.vlgmr.msrb.gmra.mxu3 %vm594_vm1, %v1047_v28 }
 0x1d3   : > { %v669_v15 = vpop.permute.xlu1 %668 }
 0x1d4   : > { %v712_v17 = vadd.f32 %v711_v8, %v669_v15 }
 0x1d8   : > { %v714_v12 = vpop.f32.mrf.mxu2 }
 0x1d9   : > { %v715_v18 = vadd.f32 %v714_v12, %v674_v7 }
 0x1da   : > { %1052 = vmatmul.msk.f32.gmra.mxu3 %vm594_vm1, %v1048_v29 }
 0x1db   : > { %v864_v25 = vpop.permute.xlu1 %863 }
 0x1e2   : > { %1053 = vmatmul.msk.f32.gmra.mxu3 %vm594_vm1, %v1049_v27 }
 0x1e3   : > { %v903_v31 = vpop.permute.xlu1 %902 }
 0x1ea   : > { %1054 = vmatmul.msk.f32.gmra.mxu3 %vm594_vm1, %v1050_v30 }
 0x255   : > { %v761_v32 = vpop.f32.mrf.mxu3 }
 0x256   : > { %v762_v40 = vadd.f32 %v761_v32, %v567_v38  ;;  %v899_v32 = vpop.permute.xlu2 %898 }
 0x258   : > { %v773_v44 = vmul.f32 0.5, %v762_v40 }
 0x25d   : > { %v764_v35 = vpop.f32.mrf.mxu3 }
 0x25e   : > { %v765_v39 = vadd.f32 %v764_v35, %v570_v36 }
 0x260   : > { %v774_v41 = vmul.f32 0.5, %v765_v39 }
 0x262   : > { %1152 = vtanh.f32 %v774_v41 }
 0x263   : > { %1154 = vtanh.f32 %v773_v44 }
 0x265   : > { %v767_v42 = vpop.f32.mrf.mxu3 }
 0x266   : > { %v768_v49 = vadd.f32 %v767_v42, %v573_v48  ;;  %v915_v42 = vstv %s914_s22 }
 0x268   : > { %v1153_v52 = vpop.eup %1152  ;;  %1156 = vtanh.f32 %v768_v49 }
 0x269   : > { %v1155_v54 = vpop.eup %1154  ;;  %v778_v55 = vadd.f32 1.0, %v1153_v52 }
 0x26a   : > { %v777_v56 = vadd.f32 1.0, %v1155_v54 }
 0x26b   : > { %v780_v58 = vmul.f32 0.5, %v778_v55 }
 0x26c   : > { %v779_v60 = vmul.f32 0.5, %v777_v56 }
 0x26d   : > { %v770_v51 = vpop.f32.mrf.mxu3 }
 0x26e   : > { %v771_v53 = vadd.f32 %v770_v51, %v576_v50  ;;  %v1157_v57 = vpop.eup %1156 }
 0x26f   : > { %v783_v62 = vmul.f32 %v1157_v57, %v779_v60 }
 0x270   : > { %1158 = vtanh.f32 %v771_v53 }
 0x276   : > { %v1159_v59 = vpop.eup %1158 }
 0x277   : > { %v784_v61 = vmul.f32 %v1159_v59, %v780_v58 }
 0x279   : > { %839 = vmatpush.msra.mxu1 %v784_v61 }
 0x27b   : > { %840 = vmatpush.msra.mxu1 %v783_v62 }
 0x27c   : > { %1063 = vmatmul.msk.f32.vlgmr.msra.gmra.mxu1 %vm594_vm1, %v1055_v63 }
 0x284   : > { %1064 = vmatmul.msk.f32.gmra.mxu1 %vm594_vm1, %v1056_v45 }
 0x28c   : > { %1065 = vmatmul.msk.f32.gmra.mxu1 %vm594_vm1, %v1057_v1 }
 0x294   : > { %1066 = vmatmul.msk.f32.gmra.mxu1 %vm594_vm1, %v1058_v2 }
 0x2f9   : > { %v842_v3 = vpop.f32.mrf.mxu1 }
 0x301   : > { %v844_v4 = vpop.f32.mrf.mxu1 }
 0x309   : > { %v846_v10 = vpop.f32.mrf.mxu1 }
 0x30a   : > { %v847_v14 = vadd.f32 %v846_v10, %v806_v11 }
 0x30c   : > { %v852_v21 = vadd.f32 %v847_v14, %v712_v17 }
 0x30e   : > { %v854_v23 = vmul.f32 0.70710677, %v852_v21 }
 0x311   : > { %v849_v16 = vpop.f32.mrf.mxu1 }
 0x312   : > { %v850_v19 = vadd.f32 %v849_v16, %v811_v13 }
 0x314   : > { %v853_v20 = vadd.f32 %v850_v19, %v715_v18 }
 0x316   : > { %v855_v22 = vmul.f32 0.70710677, %v853_v20 }
 0x318   : > { %886 = vmatpush.msrb.mxu2 %v855_v22 }
 0x31a   : > { %887 = vmatpush.msrb.mxu2 %v854_v23 }
 0x31b   : > { %1067 = vmatmul.msk.f32.vlgmr.msrb.gmra.mxu2 %vm594_vm1, %v856_v6 }
 0x323   : > { %1068 = vmatmul.msk.f32.gmra.mxu2 %vm594_vm1, %v857_v0 }
 0x39e   : > { %v889_v24 = vpop.f32.mrf.mxu2 }
 0x39f   : > { %v890_v28 = vadd.f32 %v889_v24, %v860_v26 }
 0x3a1   : > { %v895_v27 = vmax.f32 %v890_v28, 0.0 }
 0x3a3   : > { %v905_v35 = vmul.f32 %v899_v32, %v895_v27 }
 0x3a6   : > { %v892_v29 = vpop.f32.mrf.mxu2 }
 0x3a7   : > { %v893_v30 = vadd.f32 %v892_v29, %v864_v25 }
 0x3a9   : > { %v896_v33 = vmax.f32 %v893_v30, 0.0 }
 0x3ab   : > { %v906_v34 = vmul.f32 %v903_v31, %v896_v33 }
 0x3ad   : > { %v907_v36 = vadd.f32 %v906_v34, %v905_v35 }
 0x3af   : > { %v908_v37 = vrot.slane %v907_v36, 4 }
 0x3b1   : > { %v909_v38 = vadd.f32 %v908_v37, %v907_v36 }
 0x3b3   : > { %v910_v39 = vrot.slane %v909_v38, 2 }
 0x3b5   : > { %v911_v40 = vadd.f32 %v910_v39, %v909_v38 }
 0x3b7   : > { %v912_v41 = vrot.slane %v911_v40, 1 }
 0x3b9   : > { %v913_v43 = vadd.f32 %v912_v41, %v911_v40 }
 0x3bb   : > { %v916_v44 = vadd.f32 %v915_v42, %v913_v43 }
 0x3bd   : > { %917 = vst [vmem:[%s406_s21] sm:$0x1] %v916_v44 }
 0x3be   : > { %1187 = shalt.err (!%p1184_p5)
}
 0x3bf   : > { %1075 = dma.vmem_to_hbm [thread:$0]  (%p1342_p4), %s931_s14, 16, %s933_s19, %s919_s27  }
 0x3c0 PF: > { %p1081_p6 = scmp.ge.s32.totalorder %s1238_s20, 2  ;;  %s944_s30 = sand.u32 1, %s1218_s15  }
 0x3c1   : > { %s945_s12 = scalar_lea.sflag [#allocation5], %s944_s30 }
 0x3c2   : > { %p1078_p7 = pnand %p1081_p6, %p1349_p8 }
 0x3c4   : > { %p1079_p9 = pneg %p1078_p7 }
 0x3c6   : > { %1213 = dma.done.wait (%p1079_p9), %s945_s12, 16  }
 0x3c7   : > { %1215 = vsyncadd (%p1079_p9), %s945_s12, 4294967280  ;;  %s24_s20 = sadd.s32 1, %s1238_s20   ;;  %s1596_s13 = sld [smem:[#allocation9_spill]] }
 0x3c8   : > { %p21_p10 = scmp.ge.s32.totalorder %s24_s20, 4   ;;  %s1597_s18 = sld [smem:[#allocation7_spill]] }
 0x3c9   : > { %s1598_s19 = sld [smem:[#allocation8_spill]]  ;;  %s1599_s15 = smov %s1222_s16 }
 0x3ca   : > { %s1600_s16 = smov %s1226_s17  ;;  %23 = sbr.rel (!%p21_p10) target bundleno = 6 (0x6), region = 104 }
 0x3cd   : > { %s1601_s17 = smov %s1596_s13 }
 0x3cf   :  { %950 = vsyncpa [#allocation5], 1 }
 0x3d0   :  { %952 = vsyncpa [#allocation5 + $0x1], 1 }

</bundles_post_ra>
